<compile_context>
chip_gen: v7x
topology: tpu7x:2x2x1
jax: 0.10.0
libtpu: 0.0.40
codegen_flags: <defaults>
</compile_context>

<pallas_src>
import jax
import jax.numpy as jnp
from jax.experimental import pallas as pl
from jax.experimental.pallas import tpu as pltpu

FEATURE_TYPE = 11
LABEL_NUM = 3
HID1_DIM = 32

# Rows (sublanes) per grid step. x block = TB*128*4 B (lane-padded) = 1 MiB at
# TB=2048; with the out block and compiler temporaries the step stays ~10 MiB.
_MAX_TB = 2048


def _simple_model_kernel(x_ref, w1t_ref, b1_ref, w2t_ref, b2_ref, o_ref):
    # x block is (TB, 11): batch on sublanes, features on lanes (natural layout,
    # so no wrapper transpose is needed on either side of the call).
    x = x_ref[...]          # (TB, 11)
    w1t = w1t_ref[...]      # (11, 32)  = W1.T, VMEM-resident across all steps
    b1 = b1_ref[...]        # (1, 32)
    w2t = w2t_ref[...]      # (32, 3)   = W2.T
    b2 = b2_ref[...]        # (1, 3)

    # Linear1 + ReLU
    h = jnp.dot(x, w1t, preferred_element_type=jnp.float32) + b1    # (TB, 32)
    h = jnp.maximum(h, 0.0)

    # Linear2
    logits = jnp.dot(h, w2t, preferred_element_type=jnp.float32) + b2  # (TB, 3)

    # log_softmax over the label axis (3 lanes). Purely row-wise, so any
    # garbage in out-of-range rows of a partial final tile stays contained
    # there and its stores are clipped by Pallas.
    m = jnp.max(logits, axis=-1, keepdims=True)              # (TB, 1)
    shifted = logits - m
    lse = jnp.log(jnp.sum(jnp.exp(shifted), axis=-1, keepdims=True))
    o_ref[...] = shifted - lse


def _choose_tb(B):
    """Pick the batch tile (sublane dim: multiple of 8 or == B)."""
    if B <= 256:
        return B  # single full-extent block; work too small to split further
    # Guarantee >= 2 grid steps so the "parallel" axis feeds both v7x
    # TensorCores, while capping per-step VMEM at ~10 MiB.
    half = 8 * pl.cdiv(B, 16)          # ceil(B/2) rounded up to a multiple of 8
    return min(_MAX_TB, half)


def _padded_bytes(rows, cols, itemsize=4):
    """HBM footprint of a 2-D f32 array in the TPU (8,128)-tiled layout."""
    return itemsize * (pl.cdiv(rows, 8) * 8) * (pl.cdiv(cols, 128) * 128)


def simple_model_forward(x, w1, b1, w2, b2):
    """x: (B, FEATURE_TYPE) f32. Weights in PyTorch convention:
    w1 (HID1_DIM, FEATURE_TYPE), b1 (HID1_DIM,), w2 (LABEL_NUM, HID1_DIM),
    b2 (LABEL_NUM,). Returns (B, LABEL_NUM) log-probs."""
    B = x.shape[0]
    TB = _choose_tb(B)

    # Tiny constant-size layout prep only (no O(B) transposes).
    w1t = w1.T                       # (11, 32)
    w2t = w2.T                       # (32, 3)
    b1r = b1.reshape(1, HID1_DIM)
    b2r = b2.reshape(1, LABEL_NUM)

    cost = pl.CostEstimate(
        flops=2 * B * (FEATURE_TYPE * HID1_DIM + HID1_DIM * LABEL_NUM),
        transcendentals=4 * B,  # 3x exp + 1x log per row
        bytes_accessed=(_padded_bytes(B, FEATURE_TYPE)
                        + _padded_bytes(B, LABEL_NUM)
                        + _padded_bytes(FEATURE_TYPE, HID1_DIM)
                        + _padded_bytes(1, HID1_DIM)
                        + _padded_bytes(HID1_DIM, LABEL_NUM)
                        + _padded_bytes(1, LABEL_NUM)),
    )

    out = pl.pallas_call(
        _simple_model_kernel,
        out_shape=jax.ShapeDtypeStruct((B, LABEL_NUM), jnp.float32),
        grid_spec=pl.GridSpec(
            grid=(pl.cdiv(B, TB),),
            in_specs=[
                pl.BlockSpec((TB, FEATURE_TYPE), lambda i: (i, 0)),
                pl.BlockSpec((FEATURE_TYPE, HID1_DIM), lambda i: (0, 0)),
                pl.BlockSpec((1, HID1_DIM), lambda i: (0, 0)),
                pl.BlockSpec((HID1_DIM, LABEL_NUM), lambda i: (0, 0)),
                pl.BlockSpec((1, LABEL_NUM), lambda i: (0, 0)),
            ],
            out_specs=pl.BlockSpec((TB, LABEL_NUM), lambda i: (i, 0)),
        ),
        compiler_params=pltpu.CompilerParams(
            dimension_semantics=("parallel",),
            vmem_limit_bytes=32 * 1024 * 1024,  # v5e default is 16 MiB
        ),
        cost_estimate=cost,
    )(x, w1t, b1r, w2t, b2r)

    return out


def init_params(key):
    """Deterministic parameter init (PyTorch-Linear-style uniform bounds),
    stored in PyTorch (out_features, in_features) convention."""
    k1, k2, k3, k4 = jax.random.split(key, 4)
    bound1 = 1.0 / jnp.sqrt(FEATURE_TYPE)
    bound2 = 1.0 / jnp.sqrt(HID1_DIM)
    w1 = jax.random.uniform(k1, (HID1_DIM, FEATURE_TYPE), jnp.float32,
                            -bound1, bound1)
    b1 = jax.random.uniform(k2, (HID1_DIM,), jnp.float32, -bound1, bound1)
    w2 = jax.random.uniform(k3, (LABEL_NUM, HID1_DIM), jnp.float32,
                            -bound2, bound2)
    b2 = jax.random.uniform(k4, (LABEL_NUM,), jnp.float32, -bound2, bound2)
    return w1, b1, w2, b2


if __name__ == "__main__":
    key = jax.random.PRNGKey(0)
    k_x, k_p, k_x2 = jax.random.split(key, 3)
    w1, b1, w2, b2 = init_params(k_p)

    fwd = jax.jit(simple_model_forward)

    def ref_forward(xi):
        h_ref = jnp.maximum(xi @ w1.T + b1, 0.0)
        return jax.nn.log_softmax(h_ref @ w2.T + b2, axis=1)

    # Small single-tile case.
    B = 8
    x = jax.random.normal(k_x, (B, FEATURE_TYPE), jnp.float32)
    out = jax.block_until_ready(fwd(x, w1, b1, w2, b2))
    assert out.shape == (B, LABEL_NUM)
    assert jnp.allclose(out, ref_forward(x), atol=1e-5, rtol=1e-5)

    # Multi-step grid (2 tiles, partial final tile) to exercise the pipeline
    # and the masked boundary stores.
    B2 = 530
    x2 = jax.random.normal(k_x2, (B2, FEATURE_TYPE), jnp.float32)
    out2 = jax.block_until_ready(fwd(x2, w1, b1, w2, b2))
    assert out2.shape == (B2, LABEL_NUM)
    assert jnp.allclose(out2, ref_forward(x2), atol=1e-5, rtol=1e-5)

    print("KERNEL_OK")
</pallas_src>

<mosaic_0001>
module attributes {stable_mosaic.version = 11 : i64} {
  func.func @_simple_model_kernel(%arg0: i32, %arg1: memref<8x11xf32, #tpu.memory_space<vmem>>, %arg2: memref<11x32xf32, #tpu.memory_space<vmem>>, %arg3: memref<1x32xf32, #tpu.memory_space<vmem>>, %arg4: memref<32x3xf32, #tpu.memory_space<vmem>>, %arg5: memref<1x3xf32, #tpu.memory_space<vmem>>, %arg6: memref<8x3xf32, #tpu.memory_space<vmem>>) attributes {dimension_semantics = [#tpu.dimension_semantics<parallel>], iteration_bounds = array<i64: 1>, scalar_prefetch = 0 : i64, scratch_operands = 0 : i64, tpu.core_type = #tpu.core_type<tc>, window_params = [{transform_indices = @transform_0, window_bounds = array<i64: 8, 11>}, {pipeline_mode = #tpu.pipeline_mode<synchronous>, transform_indices = @transform_1, window_bounds = array<i64: 11, 32>}, {pipeline_mode = #tpu.pipeline_mode<synchronous>, transform_indices = @transform_2, window_bounds = array<i64: 1, 32>}, {pipeline_mode = #tpu.pipeline_mode<synchronous>, transform_indices = @transform_3, window_bounds = array<i64: 32, 3>}, {pipeline_mode = #tpu.pipeline_mode<synchronous>, transform_indices = @transform_4, window_bounds = array<i64: 1, 3>}, {transform_indices = @transform_5, window_bounds = array<i64: 8, 3>}]} {
    %c0 = arith.constant 0 : index
    %c0_0 = arith.constant 0 : index
    %0 = vector.load %arg1[%c0, %c0_0] : memref<8x11xf32, #tpu.memory_space<vmem>>, vector<8x11xf32>
    %c0_1 = arith.constant 0 : index
    %c0_2 = arith.constant 0 : index
    %1 = vector.load %arg2[%c0_1, %c0_2] : memref<11x32xf32, #tpu.memory_space<vmem>>, vector<11x32xf32>
    %c0_3 = arith.constant 0 : index
    %c0_4 = arith.constant 0 : index
    %2 = vector.load %arg3[%c0_3, %c0_4] : memref<1x32xf32, #tpu.memory_space<vmem>>, vector<1x32xf32>
    %c0_5 = arith.constant 0 : index
    %c0_6 = arith.constant 0 : index
    %3 = vector.load %arg4[%c0_5, %c0_6] : memref<32x3xf32, #tpu.memory_space<vmem>>, vector<32x3xf32>
    %c0_7 = arith.constant 0 : index
    %c0_8 = arith.constant 0 : index
    %4 = vector.load %arg5[%c0_7, %c0_8] : memref<1x3xf32, #tpu.memory_space<vmem>>, vector<1x3xf32>
    %cst = arith.constant dense<0.000000e+00> : vector<8x32xf32>
    %5 = tpu.matmul %0, %1, %cst {dimension_numbers = #tpu.dot_dimension_numbers<[1], [0], [0], [1], [0, 0, 1, 1], [], []>} : vector<8x11xf32>, vector<11x32xf32>, vector<8x32xf32> -> vector<8x32xf32>
    %6 = vector.broadcast %2 : vector<1x32xf32> to vector<8x32xf32>
    %7 = arith.addf %5, %6 : vector<8x32xf32>
    %cst_9 = arith.constant 0.000000e+00 : f32
    %8 = vector.broadcast %cst_9 : f32 to vector<8x32xf32>
    %9 = arith.maximumf %7, %8 : vector<8x32xf32>
    %cst_10 = arith.constant dense<0.000000e+00> : vector<8x3xf32>
    %10 = tpu.matmul %9, %3, %cst_10 {dimension_numbers = #tpu.dot_dimension_numbers<[1], [0], [0], [1], [0, 0, 1, 1], [], []>} : vector<8x32xf32>, vector<32x3xf32>, vector<8x3xf32> -> vector<8x3xf32>
    %11 = vector.broadcast %4 : vector<1x3xf32> to vector<8x3xf32>
    %12 = arith.addf %10, %11 : vector<8x3xf32>
    %cst_11 = arith.constant dense<0xFF800000> : vector<8xf32>
    %13 = vector.multi_reduction <maximumf>, %12, %cst_11 [1] : vector<8x3xf32> to vector<8xf32>
    %14 = vector.shape_cast %13 : vector<8xf32> to vector<8x1xf32>
    %15 = vector.broadcast %14 : vector<8x1xf32> to vector<8x3xf32>
    %16 = arith.subf %12, %15 : vector<8x3xf32>
    %17 = math.exp %16 : vector<8x3xf32>
    %cst_12 = arith.constant dense<0.000000e+00> : vector<8xf32>
    %18 = vector.multi_reduction <add>, %17, %cst_12 [1] : vector<8x3xf32> to vector<8xf32>
    %19 = vector.shape_cast %18 : vector<8xf32> to vector<8x1xf32>
    %20 = math.log %19 : vector<8x1xf32>
    %21 = vector.broadcast %20 : vector<8x1xf32> to vector<8x3xf32>
    %22 = arith.subf %16, %21 : vector<8x3xf32>
    %c0_13 = arith.constant 0 : index
    %c0_14 = arith.constant 0 : index
    %23 = vector.load %arg6[%c0_13, %c0_14] : memref<8x3xf32, #tpu.memory_space<vmem>>, vector<8x3xf32>
    tpu.vector_store %arg6[%c0_13, %c0_14], %22 {strides = array<i32>} : memref<8x3xf32, #tpu.memory_space<vmem>>, vector<8x3xf32>,
    return
  }
  func.func @transform_0(%arg0: i32) -> (i32, i32) {
    %c0_i32 = arith.constant 0 : i32
    %c0_i32_0 = arith.constant 0 : i32
    return %arg0, %c0_i32 : i32, i32
  }
  func.func @transform_1(%arg0: i32) -> (i32, i32) {
    %c0_i32 = arith.constant 0 : i32
    %c0_i32_0 = arith.constant 0 : i32
    %c0_i32_1 = arith.constant 0 : i32
    return %c0_i32, %c0_i32_0 : i32, i32
  }
  func.func @transform_2(%arg0: i32) -> (i32, i32) {
    %c0_i32 = arith.constant 0 : i32
    %c0_i32_0 = arith.constant 0 : i32
    %c0_i32_1 = arith.constant 0 : i32
    return %c0_i32, %c0_i32_0 : i32, i32
  }
  func.func @transform_3(%arg0: i32) -> (i32, i32) {
    %c0_i32 = arith.constant 0 : i32
    %c0_i32_0 = arith.constant 0 : i32
    %c0_i32_1 = arith.constant 0 : i32
    return %c0_i32, %c0_i32_0 : i32, i32
  }
  func.func @transform_4(%arg0: i32) -> (i32, i32) {
    %c0_i32 = arith.constant 0 : i32
    %c0_i32_0 = arith.constant 0 : i32
    %c0_i32_1 = arith.constant 0 : i32
    return %c0_i32, %c0_i32_0 : i32, i32
  }
  func.func @transform_5(%arg0: i32) -> (i32, i32) {
    %c0_i32 = arith.constant 0 : i32
    %c0_i32_0 = arith.constant 0 : i32
    return %arg0, %c0_i32 : i32, i32
  }
}

</mosaic_0001>

<bundles_post_ra>
// kernel: simple_model_forward.1
= control target key start
LH: loop header
LB: loop body
LE: loop exit
PB: predicated region body
PF: predicated region fallthrough
CT: control target
= control target key end

     0   :  { %vm39_vm0 = vcmask 1042432   ;;  %v261_v0 = vmov 0.0|0.0   ;;  %vm262_vm1 = vmmov 1   ;;  %vm263_vm3 = vmmov 0   ;;  %s328_s1 = inlined_call_operand.vmem [shape: f32[11,32], index: 1, kind: input, shape index: {}]   ;;  %s329_s3 = inlined_call_operand.vmem [shape: f32[32,3], index: 3, kind: input, shape index: {}]   ;;  %s330_s0 = inlined_call_operand.vmem [shape: f32[8,11], index: 0, kind: input, shape index: {}]   ;;  %s331_s2 = inlined_call_operand.vmem [shape: f32[1,32], index: 2, kind: input, shape index: {}]   ;;  %s332_s4 = inlined_call_operand.vmem [shape: f32[1,3], index: 4, kind: input, shape index: {}]   ;;  %s333_s5 = inlined_call_operand.vmem [shape: f32[8,3], index: 5, kind: output, shape index: {}]  }
   0x1   :  { %243 = vmatprep.subr.bf16.mxu0 %v261_v0  ;;  %v21_v1 = vld [vmem:[%s328_s1] sm:$0xff]  ;;  %v22_v2 = vld [vmem:[%s328_s1 + $0x8] sm:$0x7]  ;;  %vm245_vm2 = vmpackc.low %vm39_vm0, %vm262_vm1  ;;  %247 = vmatprep.subr.bf16.mxu1 %v261_v0  ;;  %v264_v4 = vmov 0.0   ;;  %vm35_vm4 = vcmask 89088   ;;  %vm120_vm5 = vcmask 261120  }
   0x2   :  { %v244_v3 = vpack.c.bf16 %v22_v2, %v21_v1  ;;  %229 = vmatprep.mubr.msk.f32.mxu0 %vm263_vm3, %v264_v4  ;;  %v24_v5 = vld [vmem:[%s329_s3] sm:$0xff]  ;;  %v25_v6 = vld [vmem:[%s329_s3 + $0x8] sm:$0xff]  ;;  %240 = vmatprep.mubr.msk.f32.mxu1 %vm263_vm3, %v264_v4  ;;  %v26_v9 = vld [vmem:[%s329_s3 + $0x10] sm:$0xff]  ;;  %vm194_vm6 = vcmask 23552  }
   0x3   :  { %v248_v7 = vpack.c.bf16 %v25_v6, %v24_v5  ;;  %v20_v8 = vld [vmem:[%s330_s0] sm:$0xff]  ;;  %v27_v10 = vld [vmem:[%s329_s3 + $0x18] sm:$0xff] }
   0x4   :  { %246 = vmatpush3.bf16.msk.msra.mxu0 %vm245_vm2, %v244_v3  ;;  %v251_v11 = vpack.c.bf16 %v27_v10, %v26_v9  ;;  %v212_v12 = vld [vmem:[%s331_s2] ss:$0 sm:$0xff] }
   0x5   :  { %249 = vmatpush3.bf16.msra.mxu1 %v248_v7  ;;  %v215_v17 = vld [vmem:[%s332_s4] ss:$0 sm:$0xff] }
   0x6   :  { %250 = vmatprep.subr.bf16.mxu1 %v261_v0 }
   0x7   :  { %230 = vmatmul.mubr.msk.f32.vlgmr.msra.gmra.mrb[0].mxu0 %vm35_vm4, %v20_v8 }
   0x9   :  { %252 = vmatpush3.bf16.msra.mxu1 %v251_v11 }
  0xda   :  { %v109_v13 = vpop.f32.mrb[0].mxu0 }
  0xdb   :  { %v110_v14 = vadd.f32 %v212_v12, %v109_v13  ;;  %v231_v15 = vpop.f32.mrb[1].mxu0 }
  0xdd   :  { %v113_v16 = vmax.f32 %v110_v14, 0.0 }
  0xdf   :  { %241 = vmatmul.mubr.msk.f32.vlgmr.msra.gmra.mrb[0].mxu1 %vm120_vm5, %v113_v16 }
 0x1b2   :  { %v190_v18 = vpop.f32.mrb[0].mxu1 }
 0x1b3   :  { %v191_v19 = vadd.f32 %v215_v17, %v190_v18  ;;  %v242_v20 = vpop.f32.mrb[1].mxu1 }
 0x1b5   :  { %v195_v21 = vsel %vm194_vm6, %v191_v19, -inf }
 0x1b6   :  { %196 = vmax.xlane.f32.xlu0 %v195_v21 }
 0x243   :  { %v197_v22 = vpop.xlane.xlu0 %196 }
 0x244   :  { %v198_v23 = vsub.f32 %v191_v19, %v197_v22 }
 0x246   :  { %v199_v24 = vmul.f32 1.442695, %v198_v23 }
 0x248   :  { %257 = vpow2.f32 %v199_v24 }
 0x252   :  { %v258_v25 = vpop.eup %257 }
 0x253   :  { %v201_v26 = vsel %vm194_vm6, %v258_v25, 0.0 }
 0x254   :  { %202 = vadd.xlane.f32.xlu0 %v201_v26 }
 0x2e1   :  { %v203_v27 = vpop.xlane.xlu0 %202 }
 0x2e2   :  { %259 = vlog2.f32 %v203_v27 }
 0x2ec   :  { %v260_v28 = vpop.eup %259 }
 0x2ed   :  { %v205_v29 = vmul.f32 0.6931472, %v260_v28 }
 0x2ef   :  { %v206_v30 = vsub.f32 %v198_v23, %v205_v29 }
 0x2f1   :  { %207 = vst.msk [vmem:[%s333_s5] sm:$0xff] %vm194_vm6, %v206_v30 }

</bundles_post_ra>
